<compile_context>
chip_gen: v7x
topology: tpu7x:2x2x1
jax: 0.10.0
libtpu: 0.0.40
codegen_flags: <defaults>
</compile_context>

<pallas_src>
import jax
import jax.numpy as jnp
from jax.experimental import pallas as pl
from jax.experimental.pallas import tpu as pltpu


# ---------------------------------------------------------------------------
# Kernel: pure streaming FMA over an NCHW-native (B*C, H*W) slab.
# ---------------------------------------------------------------------------
def film_kernel(sb_ref, feats_ref, out_ref):
    """One grid step == one (row-tile, HW-tile) block.

    sb_ref    : (T_r, 2) f32   column 0 = (1 + gamma), column 1 = beta,
                               one value per (b, c) row
    feats_ref : (T_r, T_hw)    NCHW-native feature block (row = b*C + c)
    out_ref   : (T_r, T_hw)
    """
    x = feats_ref[...].astype(jnp.float32)        # upcast in-register (VPU-safe on v5e)
    scale = sb_ref[:, 0:1]                        # (T_r, 1), broadcast across lanes
    beta = sb_ref[:, 1:2]
    out_ref[...] = (x * scale + beta).astype(out_ref.dtype)


# ---------------------------------------------------------------------------
# Tile helpers
# ---------------------------------------------------------------------------
def _round_down(x, m):
    return (x // m) * m


def _axis_tile(dim, mult, max_elems):
    """Tile for one axis: a multiple of `mult`, <= max_elems, and never larger
    than the dim rounded down to `mult` (full extent when dim <= mult)."""
    if dim <= mult:
        return dim
    t = min(max_elems, _round_down(dim, mult))
    return max(mult, _round_down(t, mult))


# ---------------------------------------------------------------------------
# Wrapper
# ---------------------------------------------------------------------------
def film_layer(feats_nchw, txt_emb, weight, bias, *, donate_feats=False):
    """feats_nchw: (B, C, H, W); txt_emb: (B, txt_dim);
    weight: (2C, txt_dim) (PyTorch nn.Linear layout); bias: (2C,)."""
    B, C, H, W = feats_nchw.shape
    HW = H * W
    R = B * C
    dtype = feats_nchw.dtype
    itemsize = jnp.dtype(dtype).itemsize
    sub = max(8, 32 // itemsize)               # dtype-aware sublane multiple

    # ---- chip-aware VMEM budget (v7x: 64 MiB, v5e/v6e: 128 MiB) ------------
    try:
        vmem_cap = int(pltpu.get_tpu_info().vmem_capacity_bytes)
    except Exception:
        vmem_cap = 64 << 20                    # conservative (v7x) fallback
    block_budget = max(2 << 20, vmem_cap // 8)  # ~8 MiB v7x, ~16 MiB v5e/v6e

    # ---- hoisted FiLM generator: one tiny f32 GEMM in the wrapper ----------
    film = jnp.dot(txt_emb.astype(jnp.float32), weight.T.astype(jnp.float32),
                   preferred_element_type=jnp.float32) + bias.astype(jnp.float32)
    # Packed side array: row r = b*C + c -> [1 + gamma[b, c], beta[b, c]]
    scale_beta = jnp.stack([1.0 + film[:, :C], film[:, C:]], axis=-1).reshape(R, 2)

    # ---- NCHW-native view: rows = (b, c), lanes = H*W (free reshape) -------
    feats = feats_nchw.reshape(R, HW)

    # ---- tile choice: lane axis first (lane-dense), rows from the rest -----
    max_lane = max(128, _round_down(block_budget // (sub * itemsize), 128))
    t_hw = _axis_tile(HW, 128, max_lane)
    max_rows = max(sub, _round_down(block_budget // (t_hw * itemsize), sub))
    t_r = _axis_tile(R, sub, max_rows)

    # ---- keep the grid from collapsing on big slabs (megacore/pipelining) --
    total_bytes = R * HW * itemsize
    min_rows = R if R <= sub else sub
    min_lane = HW if HW <= 128 else 128
    if total_bytes >= 4 * (2 << 20):
        while pl.cdiv(R, t_r) * pl.cdiv(HW, t_hw) < 4:
            if t_r > min_rows:
                t_r = max(sub, _round_down(t_r // 2, sub))
            elif t_hw > min_lane:
                t_hw = max(128, _round_down(t_hw // 2, 128))
            else:
                break

    grid = (pl.cdiv(R, t_r), pl.cdiv(HW, t_hw))
    block_bytes = t_r * t_hw * itemsize
    # in + out double-buffered, packed side stream, + headroom; <= ~80% VMEM.
    vmem_limit = int(min(int(vmem_cap * 0.8),
                         max(16 << 20, 4 * block_bytes + 4 * t_r * 4 + (4 << 20))))

    cost = pl.CostEstimate(
        flops=2 * R * HW,
        transcendentals=0,
        bytes_accessed=2 * R * HW * itemsize + R * 2 * 4,
    )

    grid_spec = pltpu.PrefetchScalarGridSpec(
        num_scalar_prefetch=0,
        grid=grid,
        in_specs=[
            pl.BlockSpec((t_r, 2), lambda r, h: (r, 0)),      # packed (1+gamma, beta)
            pl.BlockSpec((t_r, t_hw), lambda r, h: (r, h)),   # feats block
        ],
        out_specs=pl.BlockSpec((t_r, t_hw), lambda r, h: (r, h)),
    )

    out = pl.pallas_call(
        film_kernel,
        out_shape=jax.ShapeDtypeStruct((R, HW), dtype),
        grid_spec=grid_spec,
        compiler_params=pltpu.CompilerParams(
            dimension_semantics=("parallel", "parallel"),
            vmem_limit_bytes=vmem_limit,
        ),
        cost_estimate=cost,
        input_output_aliases={1: 0} if donate_feats else {},
    )(scale_beta, feats)

    return out.reshape(B, C, H, W)                            # free reshape back


def film_reference(feats_nchw, txt_emb, weight, bias):
    """Plain-JAX reference mirroring the PyTorch forward."""
    B, C, H, W = feats_nchw.shape
    film = txt_emb @ weight.T + bias                          # (B, 2C)
    gamma = film[:, :C].reshape(B, C, 1, 1)
    beta = film[:, C:].reshape(B, C, 1, 1)
    return feats_nchw * (1.0 + gamma) + beta


if __name__ == "__main__":
    B, C, H, W = 2, 4, 16, 16
    txt_dim = 32

    key = jax.random.PRNGKey(0)
    k_feats, k_txt, k_w, k_b = jax.random.split(key, 4)

    feats = jax.random.normal(k_feats, (B, C, H, W), dtype=jnp.float32)
    txt_emb = jax.random.normal(k_txt, (B, txt_dim), dtype=jnp.float32)
    # Deterministic "nn.Linear(txt_dim, 2*C)" parameters (PyTorch layout).
    weight = jax.random.normal(k_w, (2 * C, txt_dim), dtype=jnp.float32) * 0.05
    bias = jax.random.normal(k_b, (2 * C,), dtype=jnp.float32) * 0.05

    film_jit = jax.jit(film_layer)
    out = jax.block_until_ready(film_jit(feats, txt_emb, weight, bias))
    ref = film_reference(feats, txt_emb, weight, bias)

    assert out.shape == (B, C, H, W)
    assert jnp.allclose(out, ref, atol=1e-5, rtol=1e-5), "mismatch vs reference"
    print("KERNEL_OK")
</pallas_src>

<mosaic_0001>
module attributes {stable_mosaic.version = 11 : i64} {
  func.func @film_kernel(%arg0: i32, %arg1: i32, %arg2: memref<8x2xf32, #tpu.memory_space<vmem>>, %arg3: memref<8x256xf32, #tpu.memory_space<vmem>>, %arg4: memref<8x256xf32, #tpu.memory_space<vmem>>) attributes {dimension_semantics = [#tpu.dimension_semantics<parallel>, #tpu.dimension_semantics<parallel>], iteration_bounds = array<i64: 1, 1>, scalar_prefetch = 0 : i64, scratch_operands = 0 : i64, tpu.core_type = #tpu.core_type<tc>, window_params = [{transform_indices = @transform_0, window_bounds = array<i64: 8, 2>}, {transform_indices = @transform_1, window_bounds = array<i64: 8, 256>}, {transform_indices = @transform_2, window_bounds = array<i64: 8, 256>}]} {
    %c0 = arith.constant 0 : index
    %c0_0 = arith.constant 0 : index
    %0 = vector.load %arg3[%c0, %c0_0] : memref<8x256xf32, #tpu.memory_space<vmem>>, vector<8x256xf32>
    %c0_1 = arith.constant 0 : index
    %c0_2 = arith.constant 0 : index
    %1 = vector.load %arg2[%c0_1, %c0_2] : memref<8x2xf32, #tpu.memory_space<vmem>>, vector<8x1xf32>
    %c0_3 = arith.constant 0 : index
    %c1 = arith.constant 1 : index
    %2 = vector.load %arg2[%c0_3, %c1] : memref<8x2xf32, #tpu.memory_space<vmem>>, vector<8x1xf32>
    %3 = vector.broadcast %1 : vector<8x1xf32> to vector<8x256xf32>
    %4 = arith.mulf %0, %3 : vector<8x256xf32>
    %5 = vector.broadcast %2 : vector<8x1xf32> to vector<8x256xf32>
    %6 = arith.addf %4, %5 : vector<8x256xf32>
    %c0_4 = arith.constant 0 : index
    %c0_5 = arith.constant 0 : index
    %7 = vector.load %arg4[%c0_4, %c0_5] : memref<8x256xf32, #tpu.memory_space<vmem>>, vector<8x256xf32>
    tpu.vector_store %arg4[%c0_4, %c0_5], %6 {strides = array<i32>} : memref<8x256xf32, #tpu.memory_space<vmem>>, vector<8x256xf32>,
    return
  }
  func.func @transform_0(%arg0: i32, %arg1: i32) -> (i32, i32) {
    %c0_i32 = arith.constant 0 : i32
    %c0_i32_0 = arith.constant 0 : i32
    return %arg0, %c0_i32 : i32, i32
  }
  func.func @transform_1(%arg0: i32, %arg1: i32) -> (i32, i32) {
    %c0_i32 = arith.constant 0 : i32
    return %arg0, %arg1 : i32, i32
  }
  func.func @transform_2(%arg0: i32, %arg1: i32) -> (i32, i32) {
    %c0_i32 = arith.constant 0 : i32
    return %arg0, %arg1 : i32, i32
  }
}

</mosaic_0001>

<bundles_post_ra>
// kernel: film_layer.1
= control target key start
LH: loop header
LB: loop body
LE: loop exit
PB: predicated region body
PF: predicated region fallthrough
CT: control target
= control target key end

     0   :  { %v37_v0 = vmov 0   ;;  %v38_v2 = vmov 1   ;;  %s69_s0 = inlined_call_operand.vmem [shape: f32[8,2], index: 0, kind: input, shape index: {}]   ;;  %s70_s1 = inlined_call_operand.vmem [shape: f32[8,256], index: 1, kind: input, shape index: {}]   ;;  %s71_s2 = inlined_call_operand.vmem [shape: f32[8,256], index: 2, kind: output, shape index: {}]  }
   0x1   :  { %35 = vset.pattern.permute.xlu0 %v37_v0  ;;  %v13_v1 = vld [vmem:[%s69_s0] sm:$0xff]  ;;  %v12_v5 = vld [vmem:[%s70_s1 + $0x8] sm:$0xff] }
   0x2   :  { %16 = vperm.xlu0 %35, %v13_v1   ;;  %v11_v4 = vld [vmem:[%s70_s1] sm:$0xff] }
   0x6   :  { %36 = vset.pattern.permute.xlu0 %v38_v2 }
   0x7   :  { %22 = vperm.xlu0 %36, %v13_v1  }
  0x81   :  { %v17_v3 = vpop.permute.xlu0 %16 }
  0x82   :  { %v19_v6 = vmul.f32 %v17_v3, %v11_v4  ;;  %v20_v7 = vmul.f32 %v17_v3, %v12_v5 }
  0x86   :  { %v23_v8 = vpop.permute.xlu0 %22 }
  0x87   :  { %v25_v9 = vadd.f32 %v23_v8, %v19_v6  ;;  %v26_v10 = vadd.f32 %v23_v8, %v20_v7 }
  0x89   :  { %27 = vst [vmem:[%s71_s2] sm:$0xff] %v25_v9  ;;  %28 = vst [vmem:[%s71_s2 + $0x8] sm:$0xff] %v26_v10 }

</bundles_post_ra>
